<compile_context>
chip_gen: v6e
topology: v6e:2x2x1
jax: 0.10.0
libtpu: 0.0.40
codegen_flags: <defaults>
</compile_context>

<pallas_src>
import math
from functools import partial

import numpy as np
import jax
import jax.numpy as jnp
from jax import lax
from jax.experimental import pallas as pl
from jax.experimental.pallas import tpu as pltpu  # noqa: F401  (TPU backend)

D_MODEL = 32
NHEAD = 4
D_HEAD = D_MODEL // NHEAD
SEQ = 8
BATCH = 2
EPS = 1e-5          # PyTorch LayerNorm default
NEG_INF = -1e30     # f32 additive mask; use a finite bf16-safe value if scores ever go bf16


def _layernorm(x, gamma, beta):
    mu = jnp.mean(x, axis=-1, keepdims=True)
    var = jnp.mean((x - mu) ** 2, axis=-1, keepdims=True)
    return (x - mu) * lax.rsqrt(var + EPS) * gamma + beta


def encoder_layer_kernel(x_ref,   # (B*S, D) activations, lane-dense slab
                         w_ref,   # (D, 6*D + B*S) packed weights + mask
                         b_ref,   # (8, 3*D) packed biases / LN affines
                         o_ref):  # (B*S, D)
    x = x_ref[...].astype(jnp.float32)
    bs = x.shape[0]
    D = D_MODEL
    scale = 1.0 / math.sqrt(D_HEAD)

    # ---- static (free) slices of the packed weight slab ------------------
    wqkv = w_ref[:, 0:3 * D]                      # (D, 3D)  = in_proj_weight.T
    w_out = w_ref[:, 3 * D:4 * D]                 # (D, D)   = out_proj.weight.T
    w1 = w_ref[:, 4 * D:5 * D]                    # (D, D)   = linear1.weight.T
    w2 = w_ref[:, 5 * D:6 * D]                    # (D, D)   = linear2.weight.T
    mask = w_ref[0:bs, 6 * D:6 * D + bs]          # (B*S, B*S) block-diag additive mask

    # ---- fused QKV projection: one (B*S,D) x (D,3D) matmul + bias --------
    qkv = jnp.dot(x, wqkv, preferred_element_type=jnp.float32) + b_ref[0:1, :]

    # K^T once (single XLU transpose); per-head sublane slices feed a
    # non-transposed rhs to the score matmul.
    kT = qkv[:, D:2 * D].T                        # (D, B*S)

    # ---- multi-head self attention with fused output projection ----------
    attn_out = jnp.zeros((bs, D), jnp.float32)
    for h in range(NHEAD):
        lo, hi = h * D_HEAD, (h + 1) * D_HEAD
        q_h = qkv[:, lo:hi]                       # (B*S, Dh)
        kT_h = kT[lo:hi, :]                       # (Dh, B*S)
        v_h = qkv[:, 2 * D + lo:2 * D + hi]       # (B*S, Dh)

        s = jnp.dot(q_h, kT_h, preferred_element_type=jnp.float32) * scale + mask
        m = jnp.max(s, axis=-1, keepdims=True)
        e = jnp.exp(s - m)
        p = e * pl.reciprocal(jnp.sum(e, axis=-1, keepdims=True), approx=False)

        ctx_h = jnp.dot(p, v_h, preferred_element_type=jnp.float32)      # (B*S, Dh)
        attn_out = attn_out + jnp.dot(ctx_h, w_out[lo:hi, :],
                                      preferred_element_type=jnp.float32)
    attn_out = attn_out + b_ref[1:2, 0:D]         # out_proj bias

    # dropout1 identity; residual + norm1
    x1 = _layernorm(x + attn_out, b_ref[4:5, 0:D], b_ref[5:6, 0:D])

    # ---- feed-forward: linear2(relu(linear1(x))); dropout identity -------
    hdn = jnp.maximum(
        jnp.dot(x1, w1, preferred_element_type=jnp.float32) + b_ref[2:3, 0:D], 0.0)
    ff = jnp.dot(hdn, w2, preferred_element_type=jnp.float32) + b_ref[3:4, 0:D]

    # dropout2 identity; residual + norm2
    y = _layernorm(x1 + ff, b_ref[6:7, 0:D], b_ref[7:8, 0:D])
    o_ref[...] = y.astype(o_ref.dtype)


@jax.jit
def encoder_layer_pallas(src, w_slab, b_slab):
    """jit'd wrapper: flatten to a lane-dense (B*S, D) slab, one kernel call."""
    B, S, D = src.shape
    x2d = src.reshape(B * S, D)
    out2d = pl.pallas_call(
        encoder_layer_kernel,
        out_shape=jax.ShapeDtypeStruct((B * S, D), src.dtype),
    )(x2d, w_slab, b_slab)
    return out2d.reshape(B, S, D)


def init_params(key):
    """Deterministic parameter init matching the PyTorch module's shapes."""
    keys = jax.random.split(key, 8)

    def u(k, shape, fan_in):
        lim = 1.0 / math.sqrt(fan_in)
        return jax.random.uniform(k, shape, jnp.float32, -lim, lim)

    D = D_MODEL
    return dict(
        in_w=u(keys[0], (3 * D, D), D),    # nn.MultiheadAttention.in_proj_weight
        in_b=u(keys[1], (3 * D,), D),      # in_proj_bias
        out_w=u(keys[2], (D, D), D),       # out_proj.weight
        out_b=u(keys[3], (D,), D),         # out_proj.bias
        w1=u(keys[4], (D, D), D), b1=u(keys[5], (D,), D),   # linear1
        w2=u(keys[6], (D, D), D), b2=u(keys[7], (D,), D),   # linear2
        g1=jnp.ones((D,), jnp.float32), be1=jnp.zeros((D,), jnp.float32),
        g2=jnp.ones((D,), jnp.float32), be2=jnp.zeros((D,), jnp.float32),
    )


def pack_for_kernel(p, batch, seq):
    """Run ONCE at init: pack PyTorch-layout params into 2 lane-dense slabs."""
    D = D_MODEL
    bs = batch * seq
    assert bs <= D, "mask packing assumes B*S <= d_model rows in the weight slab"

    # Block-diagonal cross-batch mask, baked as data (no per-call iota chain).
    row_b = np.arange(bs)[:, None] // seq
    col_b = np.arange(bs)[None, :] // seq
    mask_block = np.zeros((D, bs), np.float32)
    mask_block[:bs, :] = np.where(row_b == col_b, 0.0, NEG_INF)

    w_slab = jnp.concatenate(
        [p['in_w'].T, p['out_w'].T, p['w1'].T, p['w2'].T, jnp.asarray(mask_block)],
        axis=1)                                            # (D, 6D + B*S) = (32, 208)

    def row(v):  # (D,) -> (1, 3D), zero-padded lanes
        return jnp.concatenate([v, jnp.zeros((2 * D,), jnp.float32)]).reshape(1, 3 * D)

    b_slab = jnp.concatenate(
        [p['in_b'].reshape(1, 3 * D),
         row(p['out_b']), row(p['b1']), row(p['b2']),
         row(p['g1']), row(p['be1']), row(p['g2']), row(p['be2'])],
        axis=0)                                            # (8, 3D) = (8, 96)
    return w_slab, b_slab


def reference(src, p):
    """Plain-JAX reference mirroring the PyTorch forward (dropout = identity)."""
    B, S, D = src.shape
    H, Dh = NHEAD, D_HEAD
    qkv = src @ p['in_w'].T + p['in_b']
    q, k, v = jnp.split(qkv, 3, axis=-1)
    q = q.reshape(B, S, H, Dh).transpose(0, 2, 1, 3)
    k = k.reshape(B, S, H, Dh).transpose(0, 2, 1, 3)
    v = v.reshape(B, S, H, Dh).transpose(0, 2, 1, 3)
    s = jnp.einsum('bhqe,bhke->bhqk', q, k) / math.sqrt(Dh)
    a = jax.nn.softmax(s, axis=-1)
    ctx = jnp.einsum('bhqk,bhke->bhqe', a, v).transpose(0, 2, 1, 3).reshape(B, S, D)
    attn_out = ctx @ p['out_w'].T + p['out_b']

    def ln(x, g, b):
        mu = x.mean(-1, keepdims=True)
        var = ((x - mu) ** 2).mean(-1, keepdims=True)
        return (x - mu) / jnp.sqrt(var + EPS) * g + b

    x = ln(src + attn_out, p['g1'], p['be1'])
    ff = jnp.maximum(x @ p['w1'].T + p['b1'], 0.0) @ p['w2'].T + p['b2']
    return ln(x + ff, p['g2'], p['be2'])


if __name__ == "__main__":
    key = jax.random.PRNGKey(0)
    k_src, k_par = jax.random.split(key)
    src = jax.random.normal(k_src, (BATCH, SEQ, D_MODEL), jnp.float32)

    params = init_params(k_par)
    # Packed once at init; the per-call path only sees the cached device slabs.
    w_slab, b_slab = pack_for_kernel(params, BATCH, SEQ)
    w_slab, b_slab = jax.block_until_ready((w_slab, b_slab))

    # TODO(synk): the PyTorch module also stashes averaged attention weights
    # (self.attn_weights, need_weights=True); this kernel only produces the
    # layer output. Dropout layers are identity (inference semantics).
    out = encoder_layer_pallas(src, w_slab, b_slab)
    out = jax.block_until_ready(out)

    ref = jax.block_until_ready(reference(src, params))
    if not np.allclose(np.asarray(out), np.asarray(ref), atol=1e-3, rtol=1e-3):
        raise AssertionError("Pallas kernel output mismatch vs JAX reference")

    print("KERNEL_OK")
</pallas_src>

<mosaic_0001>
module attributes {stable_mosaic.version = 11 : i64} {
  func.func @encoder_layer_kernel(%arg0: memref<16x32xf32, #tpu.memory_space<vmem>>, %arg1: memref<32x208xf32, #tpu.memory_space<vmem>>, %arg2: memref<8x96xf32, #tpu.memory_space<vmem>>, %arg3: memref<16x32xf32, #tpu.memory_space<vmem>>) attributes {dimension_semantics = [], scalar_prefetch = 0 : i64, scratch_operands = 0 : i64, tpu.core_type = #tpu.core_type<tc>} {
    %c0 = arith.constant 0 : index
    %c0_0 = arith.constant 0 : index
    %0 = vector.load %arg0[%c0, %c0_0] : memref<16x32xf32, #tpu.memory_space<vmem>>, vector<16x32xf32>
    %c0_1 = arith.constant 0 : index
    %c0_2 = arith.constant 0 : index
    %1 = vector.load %arg1[%c0_1, %c0_2] : memref<32x208xf32, #tpu.memory_space<vmem>>, vector<32x96xf32>
    %c0_3 = arith.constant 0 : index
    %c96 = arith.constant 96 : index
    %2 = vector.load %arg1[%c0_3, %c96] : memref<32x208xf32, #tpu.memory_space<vmem>>, vector<32x32xf32>
    %c0_4 = arith.constant 0 : index
    %c128 = arith.constant 128 : index
    %3 = vector.load %arg1[%c0_4, %c128] : memref<32x208xf32, #tpu.memory_space<vmem>>, vector<32x32xf32>
    %c0_5 = arith.constant 0 : index
    %c160 = arith.constant 160 : index
    %4 = vector.load %arg1[%c0_5, %c160] : memref<32x208xf32, #tpu.memory_space<vmem>>, vector<32x32xf32>
    %c0_6 = arith.constant 0 : index
    %c192 = arith.constant 192 : index
    %5 = vector.load %arg1[%c0_6, %c192] : memref<32x208xf32, #tpu.memory_space<vmem>>, vector<16x16xf32>
    %cst = arith.constant dense<0.000000e+00> : vector<16x96xf32>
    %6 = tpu.matmul %0, %1, %cst {dimension_numbers = #tpu.dot_dimension_numbers<[1], [0], [0], [1], [0, 0, 1, 1], [], []>} : vector<16x32xf32>, vector<32x96xf32>, vector<16x96xf32> -> vector<16x96xf32>
    %c0_7 = arith.constant 0 : index
    %c0_8 = arith.constant 0 : index
    %7 = vector.load %arg2[%c0_7, %c0_8] : memref<8x96xf32, #tpu.memory_space<vmem>>, vector<1x96xf32>
    %8 = vector.broadcast %7 : vector<1x96xf32> to vector<16x96xf32>
    %9 = arith.addf %6, %8 : vector<16x96xf32>
    %10 = vector.extract_strided_slice %9 {offsets = [0, 32], sizes = [16, 32], strides = [1, 1]} : vector<16x96xf32> to vector<16x32xf32>
    %11 = tpu.transpose %10, [1, 0] : vector<16x32xf32> -> vector<32x16xf32>
    %cst_9 = arith.constant 0.000000e+00 : f32
    %12 = vector.broadcast %cst_9 : f32 to vector<16x32xf32>
    %13 = vector.extract_strided_slice %9 {offsets = [0, 0], sizes = [16, 8], strides = [1, 1]} : vector<16x96xf32> to vector<16x8xf32>
    %14 = vector.extract_strided_slice %11 {offsets = [0, 0], sizes = [8, 16], strides = [1, 1]} : vector<32x16xf32> to vector<8x16xf32>
    %15 = vector.extract_strided_slice %9 {offsets = [0, 64], sizes = [16, 8], strides = [1, 1]} : vector<16x96xf32> to vector<16x8xf32>
    %cst_10 = arith.constant dense<0.000000e+00> : vector<16x16xf32>
    %16 = tpu.matmul %13, %14, %cst_10 {dimension_numbers = #tpu.dot_dimension_numbers<[1], [0], [0], [1], [0, 0, 1, 1], [], []>} : vector<16x8xf32>, vector<8x16xf32>, vector<16x16xf32> -> vector<16x16xf32>
    %cst_11 = arith.constant 0.353553385 : f32
    %17 = vector.broadcast %cst_11 : f32 to vector<16x16xf32>
    %18 = arith.mulf %16, %17 : vector<16x16xf32>
    %19 = arith.addf %18, %5 : vector<16x16xf32>
    %cst_12 = arith.constant dense<0xFF800000> : vector<16xf32>
    %20 = vector.multi_reduction <maximumf>, %19, %cst_12 [1] : vector<16x16xf32> to vector<16xf32>
    %21 = vector.shape_cast %20 : vector<16xf32> to vector<16x1xf32>
    %22 = vector.broadcast %21 : vector<16x1xf32> to vector<16x16xf32>
    %23 = arith.subf %19, %22 : vector<16x16xf32>
    %24 = math.exp %23 : vector<16x16xf32>
    %cst_13 = arith.constant dense<0.000000e+00> : vector<16xf32>
    %25 = vector.multi_reduction <add>, %24, %cst_13 [1] : vector<16x16xf32> to vector<16xf32>
    %26 = vector.shape_cast %25 : vector<16xf32> to vector<16x1xf32>
    %27 = tpu.reciprocal %26 : vector<16x1xf32> -> vector<16x1xf32>
    %28 = vector.broadcast %27 : vector<16x1xf32> to vector<16x16xf32>
    %29 = arith.mulf %24, %28 : vector<16x16xf32>
    %cst_14 = arith.constant dense<0.000000e+00> : vector<16x8xf32>
    %30 = tpu.matmul %29, %15, %cst_14 {dimension_numbers = #tpu.dot_dimension_numbers<[1], [0], [0], [1], [0, 0, 1, 1], [], []>} : vector<16x16xf32>, vector<16x8xf32>, vector<16x8xf32> -> vector<16x8xf32>
    %31 = vector.extract_strided_slice %2 {offsets = [0, 0], sizes = [8, 32], strides = [1, 1]} : vector<32x32xf32> to vector<8x32xf32>
    %cst_15 = arith.constant dense<0.000000e+00> : vector<16x32xf32>
    %32 = tpu.matmul %30, %31, %cst_15 {dimension_numbers = #tpu.dot_dimension_numbers<[1], [0], [0], [1], [0, 0, 1, 1], [], []>} : vector<16x8xf32>, vector<8x32xf32>, vector<16x32xf32> -> vector<16x32xf32>
    %33 = arith.addf %12, %32 : vector<16x32xf32>
    %34 = vector.extract_strided_slice %9 {offsets = [0, 8], sizes = [16, 8], strides = [1, 1]} : vector<16x96xf32> to vector<16x8xf32>
    %35 = vector.extract_strided_slice %11 {offsets = [8, 0], sizes = [8, 16], strides = [1, 1]} : vector<32x16xf32> to vector<8x16xf32>
    %36 = vector.extract_strided_slice %9 {offsets = [0, 72], sizes = [16, 8], strides = [1, 1]} : vector<16x96xf32> to vector<16x8xf32>
    %cst_16 = arith.constant dense<0.000000e+00> : vector<16x16xf32>
    %37 = tpu.matmul %34, %35, %cst_16 {dimension_numbers = #tpu.dot_dimension_numbers<[1], [0], [0], [1], [0, 0, 1, 1], [], []>} : vector<16x8xf32>, vector<8x16xf32>, vector<16x16xf32> -> vector<16x16xf32>
    %cst_17 = arith.constant 0.353553385 : f32
    %38 = vector.broadcast %cst_17 : f32 to vector<16x16xf32>
    %39 = arith.mulf %37, %38 : vector<16x16xf32>
    %40 = arith.addf %39, %5 : vector<16x16xf32>
    %cst_18 = arith.constant dense<0xFF800000> : vector<16xf32>
    %41 = vector.multi_reduction <maximumf>, %40, %cst_18 [1] : vector<16x16xf32> to vector<16xf32>
    %42 = vector.shape_cast %41 : vector<16xf32> to vector<16x1xf32>
    %43 = vector.broadcast %42 : vector<16x1xf32> to vector<16x16xf32>
    %44 = arith.subf %40, %43 : vector<16x16xf32>
    %45 = math.exp %44 : vector<16x16xf32>
    %cst_19 = arith.constant dense<0.000000e+00> : vector<16xf32>
    %46 = vector.multi_reduction <add>, %45, %cst_19 [1] : vector<16x16xf32> to vector<16xf32>
    %47 = vector.shape_cast %46 : vector<16xf32> to vector<16x1xf32>
    %48 = tpu.reciprocal %47 : vector<16x1xf32> -> vector<16x1xf32>
    %49 = vector.broadcast %48 : vector<16x1xf32> to vector<16x16xf32>
    %50 = arith.mulf %45, %49 : vector<16x16xf32>
    %cst_20 = arith.constant dense<0.000000e+00> : vector<16x8xf32>
    %51 = tpu.matmul %50, %36, %cst_20 {dimension_numbers = #tpu.dot_dimension_numbers<[1], [0], [0], [1], [0, 0, 1, 1], [], []>} : vector<16x16xf32>, vector<16x8xf32>, vector<16x8xf32> -> vector<16x8xf32>
    %52 = vector.extract_strided_slice %2 {offsets = [8, 0], sizes = [8, 32], strides = [1, 1]} : vector<32x32xf32> to vector<8x32xf32>
    %cst_21 = arith.constant dense<0.000000e+00> : vector<16x32xf32>
    %53 = tpu.matmul %51, %52, %cst_21 {dimension_numbers = #tpu.dot_dimension_numbers<[1], [0], [0], [1], [0, 0, 1, 1], [], []>} : vector<16x8xf32>, vector<8x32xf32>, vector<16x32xf32> -> vector<16x32xf32>
    %54 = arith.addf %33, %53 : vector<16x32xf32>
    %55 = vector.extract_strided_slice %9 {offsets = [0, 16], sizes = [16, 8], strides = [1, 1]} : vector<16x96xf32> to vector<16x8xf32>
    %56 = vector.extract_strided_slice %11 {offsets = [16, 0], sizes = [8, 16], strides = [1, 1]} : vector<32x16xf32> to vector<8x16xf32>
    %57 = vector.extract_strided_slice %9 {offsets = [0, 80], sizes = [16, 8], strides = [1, 1]} : vector<16x96xf32> to vector<16x8xf32>
    %cst_22 = arith.constant dense<0.000000e+00> : vector<16x16xf32>
    %58 = tpu.matmul %55, %56, %cst_22 {dimension_numbers = #tpu.dot_dimension_numbers<[1], [0], [0], [1], [0, 0, 1, 1], [], []>} : vector<16x8xf32>, vector<8x16xf32>, vector<16x16xf32> -> vector<16x16xf32>
    %cst_23 = arith.constant 0.353553385 : f32
    %59 = vector.broadcast %cst_23 : f32 to vector<16x16xf32>
    %60 = arith.mulf %58, %59 : vector<16x16xf32>
    %61 = arith.addf %60, %5 : vector<16x16xf32>
    %cst_24 = arith.constant dense<0xFF800000> : vector<16xf32>
    %62 = vector.multi_reduction <maximumf>, %61, %cst_24 [1] : vector<16x16xf32> to vector<16xf32>
    %63 = vector.shape_cast %62 : vector<16xf32> to vector<16x1xf32>
    %64 = vector.broadcast %63 : vector<16x1xf32> to vector<16x16xf32>
    %65 = arith.subf %61, %64 : vector<16x16xf32>
    %66 = math.exp %65 : vector<16x16xf32>
    %cst_25 = arith.constant dense<0.000000e+00> : vector<16xf32>
    %67 = vector.multi_reduction <add>, %66, %cst_25 [1] : vector<16x16xf32> to vector<16xf32>
    %68 = vector.shape_cast %67 : vector<16xf32> to vector<16x1xf32>
    %69 = tpu.reciprocal %68 : vector<16x1xf32> -> vector<16x1xf32>
    %70 = vector.broadcast %69 : vector<16x1xf32> to vector<16x16xf32>
    %71 = arith.mulf %66, %70 : vector<16x16xf32>
    %cst_26 = arith.constant dense<0.000000e+00> : vector<16x8xf32>
    %72 = tpu.matmul %71, %57, %cst_26 {dimension_numbers = #tpu.dot_dimension_numbers<[1], [0], [0], [1], [0, 0, 1, 1], [], []>} : vector<16x16xf32>, vector<16x8xf32>, vector<16x8xf32> -> vector<16x8xf32>
    %73 = vector.extract_strided_slice %2 {offsets = [16, 0], sizes = [8, 32], strides = [1, 1]} : vector<32x32xf32> to vector<8x32xf32>
    %cst_27 = arith.constant dense<0.000000e+00> : vector<16x32xf32>
    %74 = tpu.matmul %72, %73, %cst_27 {dimension_numbers = #tpu.dot_dimension_numbers<[1], [0], [0], [1], [0, 0, 1, 1], [], []>} : vector<16x8xf32>, vector<8x32xf32>, vector<16x32xf32> -> vector<16x32xf32>
    %75 = arith.addf %54, %74 : vector<16x32xf32>
    %76 = vector.extract_strided_slice %9 {offsets = [0, 24], sizes = [16, 8], strides = [1, 1]} : vector<16x96xf32> to vector<16x8xf32>
    %77 = vector.extract_strided_slice %11 {offsets = [24, 0], sizes = [8, 16], strides = [1, 1]} : vector<32x16xf32> to vector<8x16xf32>
    %78 = vector.extract_strided_slice %9 {offsets = [0, 88], sizes = [16, 8], strides = [1, 1]} : vector<16x96xf32> to vector<16x8xf32>
    %cst_28 = arith.constant dense<0.000000e+00> : vector<16x16xf32>
    %79 = tpu.matmul %76, %77, %cst_28 {dimension_numbers = #tpu.dot_dimension_numbers<[1], [0], [0], [1], [0, 0, 1, 1], [], []>} : vector<16x8xf32>, vector<8x16xf32>, vector<16x16xf32> -> vector<16x16xf32>
    %cst_29 = arith.constant 0.353553385 : f32
    %80 = vector.broadcast %cst_29 : f32 to vector<16x16xf32>
    %81 = arith.mulf %79, %80 : vector<16x16xf32>
    %82 = arith.addf %81, %5 : vector<16x16xf32>
    %cst_30 = arith.constant dense<0xFF800000> : vector<16xf32>
    %83 = vector.multi_reduction <maximumf>, %82, %cst_30 [1] : vector<16x16xf32> to vector<16xf32>
    %84 = vector.shape_cast %83 : vector<16xf32> to vector<16x1xf32>
    %85 = vector.broadcast %84 : vector<16x1xf32> to vector<16x16xf32>
    %86 = arith.subf %82, %85 : vector<16x16xf32>
    %87 = math.exp %86 : vector<16x16xf32>
    %cst_31 = arith.constant dense<0.000000e+00> : vector<16xf32>
    %88 = vector.multi_reduction <add>, %87, %cst_31 [1] : vector<16x16xf32> to vector<16xf32>
    %89 = vector.shape_cast %88 : vector<16xf32> to vector<16x1xf32>
    %90 = tpu.reciprocal %89 : vector<16x1xf32> -> vector<16x1xf32>
    %91 = vector.broadcast %90 : vector<16x1xf32> to vector<16x16xf32>
    %92 = arith.mulf %87, %91 : vector<16x16xf32>
    %cst_32 = arith.constant dense<0.000000e+00> : vector<16x8xf32>
    %93 = tpu.matmul %92, %78, %cst_32 {dimension_numbers = #tpu.dot_dimension_numbers<[1], [0], [0], [1], [0, 0, 1, 1], [], []>} : vector<16x16xf32>, vector<16x8xf32>, vector<16x8xf32> -> vector<16x8xf32>
    %94 = vector.extract_strided_slice %2 {offsets = [24, 0], sizes = [8, 32], strides = [1, 1]} : vector<32x32xf32> to vector<8x32xf32>
    %cst_33 = arith.constant dense<0.000000e+00> : vector<16x32xf32>
    %95 = tpu.matmul %93, %94, %cst_33 {dimension_numbers = #tpu.dot_dimension_numbers<[1], [0], [0], [1], [0, 0, 1, 1], [], []>} : vector<16x8xf32>, vector<8x32xf32>, vector<16x32xf32> -> vector<16x32xf32>
    %96 = arith.addf %75, %95 : vector<16x32xf32>
    %c1 = arith.constant 1 : index
    %c0_34 = arith.constant 0 : index
    %97 = vector.load %arg2[%c1, %c0_34] : memref<8x96xf32, #tpu.memory_space<vmem>>, vector<1x32xf32>
    %98 = vector.broadcast %97 : vector<1x32xf32> to vector<16x32xf32>
    %99 = arith.addf %96, %98 : vector<16x32xf32>
    %100 = arith.addf %0, %99 : vector<16x32xf32>
    %c4 = arith.constant 4 : index
    %c0_35 = arith.constant 0 : index
    %101 = vector.load %arg2[%c4, %c0_35] : memref<8x96xf32, #tpu.memory_space<vmem>>, vector<1x32xf32>
    %c5 = arith.constant 5 : index
    %c0_36 = arith.constant 0 : index
    %102 = vector.load %arg2[%c5, %c0_36] : memref<8x96xf32, #tpu.memory_space<vmem>>, vector<1x32xf32>
    %cst_37 = arith.constant dense<0.000000e+00> : vector<16xf32>
    %103 = vector.multi_reduction <add>, %100, %cst_37 [1] : vector<16x32xf32> to vector<16xf32>
    %104 = vector.shape_cast %103 : vector<16xf32> to vector<16x1xf32>
    %cst_38 = arith.constant 3.200000e+01 : f32
    %105 = vector.broadcast %cst_38 : f32 to vector<16x1xf32>
    %106 = arith.divf %104, %105 : vector<16x1xf32>
    %107 = vector.broadcast %106 : vector<16x1xf32> to vector<16x32xf32>
    %108 = arith.subf %100, %107 : vector<16x32xf32>
    %109 = arith.mulf %108, %108 : vector<16x32xf32>
    %cst_39 = arith.constant dense<0.000000e+00> : vector<16xf32>
    %110 = vector.multi_reduction <add>, %109, %cst_39 [1] : vector<16x32xf32> to vector<16xf32>
    %111 = vector.shape_cast %110 : vector<16xf32> to vector<16x1xf32>
    %cst_40 = arith.constant 3.200000e+01 : f32
    %112 = vector.broadcast %cst_40 : f32 to vector<16x1xf32>
    %113 = arith.divf %111, %112 : vector<16x1xf32>
    %114 = vector.broadcast %106 : vector<16x1xf32> to vector<16x32xf32>
    %115 = arith.subf %100, %114 : vector<16x32xf32>
    %cst_41 = arith.constant 9.99999974E-6 : f32
    %116 = vector.broadcast %cst_41 : f32 to vector<16x1xf32>
    %117 = arith.addf %113, %116 : vector<16x1xf32>
    %118 = math.rsqrt %117 : vector<16x1xf32>
    %119 = vector.broadcast %118 : vector<16x1xf32> to vector<16x32xf32>
    %120 = arith.mulf %115, %119 : vector<16x32xf32>
    %121 = vector.broadcast %101 : vector<1x32xf32> to vector<16x32xf32>
    %122 = arith.mulf %120, %121 : vector<16x32xf32>
    %123 = vector.broadcast %102 : vector<1x32xf32> to vector<16x32xf32>
    %124 = arith.addf %122, %123 : vector<16x32xf32>
    %cst_42 = arith.constant dense<0.000000e+00> : vector<16x32xf32>
    %125 = tpu.matmul %124, %3, %cst_42 {dimension_numbers = #tpu.dot_dimension_numbers<[1], [0], [0], [1], [0, 0, 1, 1], [], []>} : vector<16x32xf32>, vector<32x32xf32>, vector<16x32xf32> -> vector<16x32xf32>
    %c2 = arith.constant 2 : index
    %c0_43 = arith.constant 0 : index
    %126 = vector.load %arg2[%c2, %c0_43] : memref<8x96xf32, #tpu.memory_space<vmem>>, vector<1x32xf32>
    %127 = vector.broadcast %126 : vector<1x32xf32> to vector<16x32xf32>
    %128 = arith.addf %125, %127 : vector<16x32xf32>
    %cst_44 = arith.constant 0.000000e+00 : f32
    %129 = vector.broadcast %cst_44 : f32 to vector<16x32xf32>
    %130 = arith.maximumf %128, %129 : vector<16x32xf32>
    %cst_45 = arith.constant dense<0.000000e+00> : vector<16x32xf32>
    %131 = tpu.matmul %130, %4, %cst_45 {dimension_numbers = #tpu.dot_dimension_numbers<[1], [0], [0], [1], [0, 0, 1, 1], [], []>} : vector<16x32xf32>, vector<32x32xf32>, vector<16x32xf32> -> vector<16x32xf32>
    %c3 = arith.constant 3 : index
    %c0_46 = arith.constant 0 : index
    %132 = vector.load %arg2[%c3, %c0_46] : memref<8x96xf32, #tpu.memory_space<vmem>>, vector<1x32xf32>
    %133 = vector.broadcast %132 : vector<1x32xf32> to vector<16x32xf32>
    %134 = arith.addf %131, %133 : vector<16x32xf32>
    %135 = arith.addf %124, %134 : vector<16x32xf32>
    %c6 = arith.constant 6 : index
    %c0_47 = arith.constant 0 : index
    %136 = vector.load %arg2[%c6, %c0_47] : memref<8x96xf32, #tpu.memory_space<vmem>>, vector<1x32xf32>
    %c7 = arith.constant 7 : index
    %c0_48 = arith.constant 0 : index
    %137 = vector.load %arg2[%c7, %c0_48] : memref<8x96xf32, #tpu.memory_space<vmem>>, vector<1x32xf32>
    %cst_49 = arith.constant dense<0.000000e+00> : vector<16xf32>
    %138 = vector.multi_reduction <add>, %135, %cst_49 [1] : vector<16x32xf32> to vector<16xf32>
    %139 = vector.shape_cast %138 : vector<16xf32> to vector<16x1xf32>
    %cst_50 = arith.constant 3.200000e+01 : f32
    %140 = vector.broadcast %cst_50 : f32 to vector<16x1xf32>
    %141 = arith.divf %139, %140 : vector<16x1xf32>
    %142 = vector.broadcast %141 : vector<16x1xf32> to vector<16x32xf32>
    %143 = arith.subf %135, %142 : vector<16x32xf32>
    %144 = arith.mulf %143, %143 : vector<16x32xf32>
    %cst_51 = arith.constant dense<0.000000e+00> : vector<16xf32>
    %145 = vector.multi_reduction <add>, %144, %cst_51 [1] : vector<16x32xf32> to vector<16xf32>
    %146 = vector.shape_cast %145 : vector<16xf32> to vector<16x1xf32>
    %cst_52 = arith.constant 3.200000e+01 : f32
    %147 = vector.broadcast %cst_52 : f32 to vector<16x1xf32>
    %148 = arith.divf %146, %147 : vector<16x1xf32>
    %149 = vector.broadcast %141 : vector<16x1xf32> to vector<16x32xf32>
    %150 = arith.subf %135, %149 : vector<16x32xf32>
    %cst_53 = arith.constant 9.99999974E-6 : f32
    %151 = vector.broadcast %cst_53 : f32 to vector<16x1xf32>
    %152 = arith.addf %148, %151 : vector<16x1xf32>
    %153 = math.rsqrt %152 : vector<16x1xf32>
    %154 = vector.broadcast %153 : vector<16x1xf32> to vector<16x32xf32>
    %155 = arith.mulf %150, %154 : vector<16x32xf32>
    %156 = vector.broadcast %136 : vector<1x32xf32> to vector<16x32xf32>
    %157 = arith.mulf %155, %156 : vector<16x32xf32>
    %158 = vector.broadcast %137 : vector<1x32xf32> to vector<16x32xf32>
    %159 = arith.addf %157, %158 : vector<16x32xf32>
    %c0_54 = arith.constant 0 : index
    %c0_55 = arith.constant 0 : index
    %160 = vector.load %arg3[%c0_54, %c0_55] : memref<16x32xf32, #tpu.memory_space<vmem>>, vector<16x32xf32>
    tpu.vector_store %arg3[%c0_54, %c0_55], %159 {strides = array<i32>} : memref<16x32xf32, #tpu.memory_space<vmem>>, vector<16x32xf32>,
    return
  }
}

</mosaic_0001>

<bundles_post_ra>
// kernel: encoder_layer_pallas.1
= control target key start
LH: loop header
LB: loop body
LE: loop exit
PB: predicated region body
PF: predicated region fallthrough
CT: control target
= control target key end

     0   :  { %8 = vsyncpa [#allocation3], 0  ;;  %s2217_s0 = inlined_call_operand.hbm [shape: f32[16,32], index: 0, kind: input, shape index: {}]   ;;  %s2218_s1 = inlined_call_operand.hbm [shape: f32[32,208], index: 1, kind: input, shape index: {}]   ;;  %s2219_s2 = inlined_call_operand.hbm [shape: f32[8,96], index: 2, kind: input, shape index: {}]   ;;  %s2220_s3 = inlined_call_operand.hbm [shape: f32[16,32], index: 3, kind: output, shape index: {}]  }
   0x1   :  { %9 = vsyncpa [#allocation6], 0 }
   0x2   :  { %10 = vsyncpa [#allocation4], 0  ;;  %s1982_s12 = smov [#allocation5]  }
   0x3   :  { %s28_s13 = sshll.u32 %s1982_s12, 4  ;;  %s29_s13 = int_to_ptr.vmem [resolvable:$true] %s28_s13 }
   0x4   :  { %s1904_s14 = scalar_lea.vmem %s29_s13, 1024  ;;  %p1909_p1 = scmp.lt.s32.totalorder %s29_s13, %s29_s13 }
   0x5   :  { %p1905_p0 = scmp.ne.s32.totalorder %s29_s13, %s1904_s14  ;;  %p1910_p2 = scmp.lt.s32.totalorder %s1904_s14, %s1904_s14 }
   0x7   :  { %p1911_p3 = por %p1910_p2, %p1909_p1 }
   0x9   :  { %p1912_p4 = pnand %p1911_p3, %p1905_p0 }
   0xb   :  { %1915 = shalt.err (!%p1912_p4)
}
   0xc   :  { %s1983_s15 = smov 256   ;;  %s1984_s16 = smov 16  }
   0xd   :  { %34 = dma.hbm_to_vmem [thread:$0]  %s2218_s1, 1024, %s29_s13, [#allocation6], %s1983_s15, %s1983_s15, %s1984_s16  }
   0xe   :  { %s1985_s19 = smov [#allocation2]  }
   0xf   :  { %s16_s20 = sshll.u32 %s1985_s19, 4  ;;  %s17_s20 = int_to_ptr.vmem [resolvable:$true] %s16_s20 }
  0x10   :  { %s1924_s21 = scalar_lea.vmem %s17_s20, 256  ;;  %p1929_p6 = scmp.lt.s32.totalorder %s17_s20, %s17_s20 }
  0x11   :  { %p1925_p5 = scmp.ne.s32.totalorder %s17_s20, %s1924_s21  ;;  %p1930_p7 = scmp.lt.s32.totalorder %s1924_s21, %s1924_s21 }
  0x13   :  { %p1931_p8 = por %p1930_p7, %p1929_p6 }
  0x15   :  { %p1932_p9 = pnand %p1931_p8, %p1925_p5 }
  0x17   :  { %1935 = shalt.err (!%p1932_p9)
}
  0x18   :  { %s1986_s22 = smov 128   ;;  %s1987_s23 = smov 8  }
  0x19   :  { %22 = dma.hbm_to_vmem [thread:$0]  %s2217_s0, 256, %s17_s20, [#allocation3], %s1986_s22, %s1986_s22, %s1987_s23  }
  0x1a   :  { %s1988_s1 = smov [#allocation7]  }
  0x1b   :  { %s41_s26 = sshll.u32 %s1988_s1, 4  ;;  %s42_s26 = int_to_ptr.vmem [resolvable:$true] %s41_s26 }
  0x1c   :  { %s1944_s27 = scalar_lea.vmem %s42_s26, 128  ;;  %p1949_p11 = scmp.lt.s32.totalorder %s42_s26, %s42_s26 }
  0x1d   :  { %p1945_p10 = scmp.ne.s32.totalorder %s42_s26, %s1944_s27  ;;  %p1950_p12 = scmp.lt.s32.totalorder %s1944_s27, %s1944_s27 }
  0x1f   :  { %p1951_p13 = por %p1950_p12, %p1949_p11 }
  0x21   :  { %p1952_p0 = pnand %p1951_p13, %p1945_p10 }
  0x23   :  { %1955 = shalt.err (!%p1952_p0)
}
  0x24   :  { %44 = dma.hbm_to_vmem [thread:$0]  %s2219_s2, 128, %s42_s26, [#allocation6]  }
  0x25   :  { %1976 = dma.done.wait [#allocation3], 256  }
  0x26   :  { %1977 = vsyncadd [#allocation3], 4294967040 }
  0x27   :  { %1978 = dma.done.wait [#allocation6], 1152  }
  0x28   :  { %1979 = vsyncadd [#allocation6], 4294966144  ;;  %vm69_vm0 = vcmask 261120   ;;  %v2034_v0 = vld [vmem:[#allocation5 + $0x30] sm:$0xff]  ;;  %v2036_v1 = vld [vmem:[#allocation5 + $0x20] sm:$0xff]  ;;  %vm157_vm1 = vcmask 64512  }
  0x29   :  { %1727 = vmatprep.subr.mxu0 %v2034_v0  ;;  %v2039_v2 = vld [vmem:[#allocation2] sm:$0xff]  ;;  %v2048_v4 = vld [vmem:[#allocation5] sm:$0xff]  ;;  %v2052_v5 = vld [vmem:[#allocation2 + $0x8] sm:$0xff]  ;;  %s1989_s0 = smov 88   ;;  %s1990_s2 = smov 96   ;;  %vm253_vm2 = vcmask 130048  }
  0x2a   :  { %1728 = vmatpush3.msra.mxu0 %v2034_v0  ;;  %v2042_v3 = vld [vmem:[#allocation5 + $0x10] sm:$0xff]  ;;  %1735 = vmatprep.mubr.msk.f32.mxu0 %vm69_vm0, %v2039_v2  ;;  %v1619_v6 = vld [vmem:[#allocation7] ss:$0 sm:$0xff]  ;;  %s1991_s30 = smov 120   ;;  %v2072_v11 = vld [vmem:[#allocation5 + $0x18] sm:$0xff]  ;;  %s1992_s4 = smov 64  }
  0x2b   :  { %1729 = vmatprep.subr.mxu0 %v2036_v1  ;;  %v2074_v12 = vld [vmem:[#allocation5 + $0x8] sm:$0xff]  ;;  %s1993_s5 = smov 56   ;;  %s1994_s6 = smov 32  }
  0x2c   :  { %1730 = vmatpush3.msra.mxu0 %v2036_v1  ;;  %s1995_s7 = smov 80   ;;  %s1996_s8 = smov 112  }
  0x2d   :  { %1731 = vmatprep.subr.mxu0 %v2042_v3  ;;  %s1997_s9 = smov 72   ;;  %s1998_s10 = smov 104  }
  0x2e   :  { %1732 = vmatpush3.msra.mxu0 %v2042_v3  ;;  %s1999_s11 = smov 48   ;;  %s2000_s12 = smov 40  }
  0x2f   :  { %1733 = vmatprep.subr.mxu0 %v2048_v4  ;;  %s2001_s13 = smov [#allocation8]  }
  0x30   :  { %1734 = vmatpush3.msra.mxu0 %v2048_v4  ;;  %s1606_s14 = sshll.u32 %s2001_s13, 4  ;;  %s1607_s14 = int_to_ptr.vmem [resolvable:$true] %s1606_s14 }
  0x31   :  { %1736 = vmatmul.mubr.msk.f32.vlgmr.msra.gmra.mxu0 %vm69_vm0, %v2052_v5  ;;  %s1956_s15 = scalar_lea.vmem %s1607_s14, 256  ;;  %p1961_p2 = scmp.lt.s32.totalorder %s1607_s14, %s1607_s14 }
  0x32   :  { %p1957_p1 = scmp.ne.s32.totalorder %s1607_s14, %s1956_s15  ;;  %p1962_p3 = scmp.lt.s32.totalorder %s1956_s15, %s1956_s15 }
  0x34   :  { %p1963_p4 = por %p1962_p3, %p1961_p2 }
  0x36   :  { %p1964_p5 = pnand %p1963_p4, %p1957_p1 }
  0xf1   :  { %v1737_v7 = vpop.f32.mrf.mxu0 }
  0xf2   :  { %v2058_v8 = vadd.f32 %v1737_v7, %v1619_v6 }
  0xf3   :  { %v142_v9 = vpop.f32.mrf.mxu0 }
  0xf4   :  { %v2060_v10 = vadd.f32 %v1619_v6, %v142_v9  ;;  %369 = vrot.lane.b32.xlu1 %v2058_v8, %s1989_s0  ;;  %155 = vrot.lane.b32.xlu0 %v2058_v8, %s1990_s2 }
  0xf6   :  { %1742 = vmatprep.mubr.msk.f32.mxu1 %vm157_vm1, %v2060_v10 }
  0xf8   :  { %367 = vrot.lane.b32.xlu1 %v2060_v10, %s1989_s0  ;;  %153 = vrot.lane.b32.xlu0 %v2060_v10, %s1990_s2 }
  0xfc   :  { %365 = vrot.lane.b32.xlu1 %v2058_v8, %s1991_s30  ;;  %363 = vrot.lane.b32.xlu0 %v2060_v10, %s1991_s30 }
 0x100   :  { %247 = vrot.lane.b32.xlu1 %v2072_v11, %s1992_s4  ;;  %245 = vrot.lane.b32.xlu0 %v2074_v12, %s1992_s4 }
 0x166   :  { %v156_v13 = vpop.permute.xlu0 %155  ;;  %v370_v14 = vpop.permute.xlu1 %369 }
 0x167   :  { %1738 = vmatprep.subr.msk.mxu1 %vm157_vm1, %v156_v13 }
 0x168   :  { %1739 = vmatpush3.xpose.msk.msra.mxu1 %vm157_vm1, %v156_v13 }
 0x16a   :  { %v154_v15 = vpop.permute.xlu0 %153  ;;  %v368_v17 = vpop.permute.xlu1 %367 }
 0x16b   :  { %1740 = vmatprep.subr.msk.mxu1 %vm157_vm1, %v154_v15 }
 0x16c   :  { %1741 = vmatpush3.xpose.msk.msra.mxu1 %vm157_vm1, %v154_v15 }
 0x16d   :  { %1752 = vmatprep.subr.msk.mxu1 %vm157_vm1, %v370_v14 }
 0x16e   :  { %v364_v16 = vpop.permute.xlu0 %363  ;;  %v366_v18 = vpop.permute.xlu1 %365 }
 0x16f   :  { %1743 = vmatmul.mubr.msk.f32.vlgmr.msra.gmra.mxu1 %vm157_vm1, %v2058_v8 }
 0x170   :  { %1753 = vmatpush3.xpose.msk.msra.mxu1 %vm157_vm1, %v370_v14  ;;  %1756 = vmatprep.mubr.msk.f32.mxu1 %vm157_vm1, %v364_v16 }
 0x171   :  { %1754 = vmatprep.subr.msk.mxu1 %vm157_vm1, %v368_v17 }
 0x172   :  { %v2092_v20 = vpop.permute.xlu1 %247  ;;  %v2094_v23 = vpop.permute.xlu0 %245 }
 0x174   :  { %1755 = vmatpush3.xpose.msk.msra.mxu1 %vm157_vm1, %v368_v17 }
 0x177   :  { %1757 = vmatmul.mubr.msk.f32.vlgmr.msra.gmra.mxu1 %vm157_vm1, %v366_v18 }
 0x22f   :  { %v1744_v19 = vpop.f32.mrf.mxu1 }
 0x230   :  { %v242_v21 = vmul.f32 0.35355338, %v1744_v19 }
 0x231   :  { %v232_v22 = vpop.f32.mrf.mxu1 }
 0x232   :  { %v241_v24 = vmul.f32 0.35355338, %v232_v22  ;;  %v252_v25 = vadd.f32 %v2092_v20, %v242_v21 }
 0x234   :  { %v257_v26 = vsel %vm253_vm2, %v252_v25, -inf  ;;  %v251_v27 = vadd.f32 %v2094_v23, %v241_v24 }
 0x235   :  { %258 = vmax.xlane.f32.xlu1 %v257_v26 }
 0x236   :  { %v254_v28 = vsel %vm253_vm2, %v251_v27, -inf }
 0x237   :  { %v1758_v29 = vpop.f32.mrf.mxu1  ;;  %255 = vmax.xlane.f32.xlu0 %v254_v28 }
 0x238   :  { %v455_v31 = vmul.f32 0.35355338, %v1758_v29 }
 0x239   :  { %v445_v30 = vpop.f32.mrf.mxu1 }
 0x23a   :  { %v454_v32 = vmul.f32 0.35355338, %v445_v30  ;;  %v457_v35 = vadd.f32 %v455_v31, %v2092_v20 }
 0x23c   :  { %v456_v33 = vadd.f32 %v454_v32, %v2094_v23  ;;  %v461_v36 = vsel %vm253_vm2, %v457_v35, -inf }
 0x23e   :  { %v458_v34 = vsel %vm253_vm2, %v456_v33, -inf }
 0x23f   :  { %459 = vmax.xlane.f32.xlu0 %v458_v34 }
 0x243   :  { %462 = vmax.xlane.f32.xlu0 %v461_v36 }
 0x246   :  { %278 = vrot.lane.b32.xlu1 %v2058_v8, %s1992_s4 }
 0x2be   :  { %v259_v37 = vpop.xlane.xlu1 %258 }
 0x2bf   :  { %v261_v38 = vsub.f32 %v252_v25, %v259_v37 }
 0x2c0   :  { %v256_v39 = vpop.xlane.xlu0 %255 }
 0x2c1   :  { %v264_v40 = vmul.f32 1.442695, %v261_v38  ;;  %v260_v41 = vsub.f32 %v251_v27, %v256_v39 }
 0x2c2   :  { %v279_v42 = vpop.permute.xlu1 %278 }
 0x2c3   :  { %1856 = vpow2.f32 %v264_v40  ;;  %v262_v43 = vmul.f32 1.442695, %v260_v41  ;;  %1745 = vmatprep.subr.mxu0 %v279_v42 }
 0x2c4   :  { %1746 = vmatpush3.msra.mxu0 %v279_v42 }
 0x2c5   :  { %1858 = vpow2.f32 %v262_v43 }
 0x2c8   :  { %v460_v44 = vpop.xlane.xlu0 %459 }
 0x2c9   :  { %v464_v54 = vsub.f32 %v456_v33, %v460_v44 }
 0x2cb   :  { %v466_v55 = vmul.f32 1.442695, %v464_v54 }
 0x2cc   :  { %v463_v45 = vpop.xlane.xlu0 %462 }
 0x2cd   :  { %v465_v46 = vsub.f32 %v457_v35, %v463_v45 }
 0x2cf   :  { %v468_v47 = vmul.f32 1.442695, %v465_v46 }
 0x2d0   :  { %v1857_v48 = vpop.eup %1856 }
 0x2d1   :  { %1860 = vpow2.f32 %v468_v47  ;;  %v269_v49 = vsel %vm253_vm2, %v1857_v48, 0.0 }
 0x2d2   :  { %v1859_v50 = vpop.eup %1858  ;;  %270 = vadd.xlane.f32.xlu0 %v269_v49  ;;  %1862 = vpow2.f32 %v466_v55 }
 0x2d3   :  { %v266_v51 = vsel %vm253_vm2, %v1859_v50, 0.0 }
 0x2d4   :  { %267 = vadd.xlane.f32.xlu1 %v266_v51 }
 0x2de   :  { %v1861_v52 = vpop.eup %1860 }
 0x2df   :  { %v473_v53 = vsel %vm253_vm2, %v1861_v52, 0.0  ;;  %v1863_v56 = vpop.eup %1862 }
 0x2e0   :  { %474 = vadd.xlane.f32.xlu0 %v473_v53  ;;  %v470_v57 = vsel %vm253_vm2, %v1863_v56, 0.0 }
 0x2e5   :  { %482 = vrot.lane.b32.xlu1 %v2058_v8, %s1993_s5 }
 0x2f6   :  { %276 = vrot.lane.b32.xlu0 %v2060_v10, %s1992_s4 }
 0x2fa   :  { %568 = vrot.lane.b32.xlu0 %v2042_v3, %s1994_s6 }
 0x2fe   :  { %741 = vrot.lane.b32.xlu0 %v2060_v10, %s1995_s7 }
 0x302   :  { %739 = vrot.lane.b32.xlu0 %v2058_v8, %s1996_s8 }
 0x306   :  { %1032 = vrot.lane.b32.xlu0 %v2060_v10, %s1997_s9 }
 0x309   :  { %471 = vadd.xlane.f32.xlu1 %v470_v57 }
 0x30a   :  { %1030 = vrot.lane.b32.xlu0 %v2058_v8, %s1998_s10 }
 0x31a   :  { %480 = vrot.lane.b32.xlu1 %v2060_v10, %s1993_s5 }
 0x31e   :  { %743 = vrot.lane.b32.xlu1 %v2058_v8, %s1995_s7 }
 0x322   :  { %737 = vrot.lane.b32.xlu1 %v2060_v10, %s1996_s8 }
 0x326   :  { %1034 = vrot.lane.b32.xlu1 %v2058_v8, %s1997_s9 }
 0x32a   :  { %1028 = vrot.lane.b32.xlu1 %v2060_v10, %s1998_s10 }
 0x35b   :  { %v271_v58 = vpop.xlane.xlu0 %270 }
 0x35c   :  { %1864 = vrcp.f32 %v271_v58 }
 0x35d   :  { %v268_v59 = vpop.xlane.xlu1 %267 }
 0x35e   :  { %1866 = vrcp.f32 %v268_v59 }
 0x361   :  { %v483_v7 = vpop.permute.xlu1 %482 }
 0x369   :  { %v475_v60 = vpop.xlane.xlu0 %474  ;;  %v1865_v61 = vpop.eup %1864 }
 0x36a   :  { %v275_v6 = vmul.f32 %v1865_v61, %v1857_v48  ;;  %1868 = vrcp.f32 %v475_v60 }
 0x36b   :  { %v1867_v62 = vpop.eup %1866 }
 0x36c   :  { %v274_v63 = vmul.f32 %v1867_v62, %v1859_v50 }
 0x36d   :  { %v277_v3 = vpop.permute.xlu0 %276 }
 0x36e   :  { %1747 = vmatprep.subr.mxu0 %v277_v3  ;;  %1749 = vmatprep.mubr.msk.f32.mxu0 %vm253_vm2, %v274_v63 }
 0x36f   :  { %1748 = vmatpush3.msra.mxu0 %v277_v3 }
 0x370   :  { %1750 = vmatmul.mubr.msk.f32.vlgmr.msra.gmra.mxu0 %vm253_vm2, %v275_v6  ;;  %1759 = vmatprep.subr.mxu0 %v483_v7 }
 0x371   :  { %1760 = vmatpush3.msra.mxu0 %v483_v7  ;;  %v569_v14 = vpop.permute.xlu0 %568 }
 0x375   :  { %v742_v26 = vpop.permute.xlu0 %741 }
 0x377   :  { %v1869_v15 = vpop.eup %1868 }
 0x378   :  { %v479_v18 = vmul.f32 %v1869_v15, %v1861_v52 }
 0x379   :  { %v740_v29 = vpop.permute.xlu0 %739 }
 0x37d   :  { %v1033_v31 = vpop.permute.xlu0 %1032 }
 0x381   :  { %v1031_v32 = vpop.permute.xlu0 %1030 }
 0x392   :  { %v472_v9 = vpop.xlane.xlu1 %471 }
 0x393   :  { %1870 = vrcp.f32 %v472_v9 }
 0x396   :  { %v481_v13 = vpop.permute.xlu1 %480 }
 0x397   :  { %1761 = vmatprep.subr.mxu0 %v481_v13 }
 0x398   :  { %1762 = vmatpush3.msra.mxu0 %v481_v13 }
 0x399   :  { %1766 = vmatprep.subr.mxu0 %v569_v14 }
 0x39a   :  { %v744_v19 = vpop.permute.xlu1 %743 }
 0x39e   :  { %v738_v24 = vpop.permute.xlu1 %737 }
 0x3a0   :  { %v1871_v16 = vpop.eup %1870 }
 0x3a1   :  { %v478_v17 = vmul.f32 %v1871_v16, %v1863_v56 }
 0x3a2   :  { %v1035_v28 = vpop.permute.xlu1 %1034 }
 0x3a3   :  { %1763 = vmatprep.mubr.msk.f32.mxu0 %vm253_vm2, %v478_v17 }
 0x3a4   :  { %1764 = vmatmul.mubr.msk.f32.vlgmr.msra.gmra.mxu0 %vm253_vm2, %v479_v18 }
 0x3a5   :  { %1767 = vmatpush3.msra.mxu0 %v569_v14 }
 0x3a6   :  { %1776 = vmatprep.subr.msk.mxu0 %vm157_vm1, %v744_v19  ;;  %v1029_v30 = vpop.permute.xlu1 %1028 }
 0x430   :  { %v2129_v21 = vpop.f32.mrf.mxu0 }
 0x432   :  { %v354_v22 = vpop.f32.mrf.mxu0 }
 0x433   :  { %1773 = vmatprep.mubr.msk.f32.mxu1 %vm157_vm1, %v354_v22 }
 0x464   :  { %v1765_v25 = vpop.f32.mrf.mxu0 }
 0x466   :  { %v558_v27 = vpop.f32.mrf.mxu0 }
 0x467   :  { %1768 = vmatprep.mubr.msk.f32.mxu0 %vm157_vm1, %v558_v27 }
 0x468   :  { %1769 = vmatmul.mubr.msk.f32.vlgmr.msra.gmra.mxu0 %vm157_vm1, %v1765_v25 }
 0x469   :  { %1777 = vmatpush3.xpose.msk.msra.mxu0 %vm157_vm1, %v744_v19  ;;  %1780 = vmatprep.mubr.msk.f32.mxu0 %vm157_vm1, %v738_v24 }
 0x46a   :  { %1778 = vmatprep.subr.msk.mxu0 %vm157_vm1, %v742_v26 }
 0x46d   :  { %1779 = vmatpush3.xpose.msk.msra.mxu0 %vm157_vm1, %v742_v26 }
 0x46e   :  { %1795 = vmatprep.subr.msk.mxu0 %vm157_vm1, %v1035_v28 }
 0x470   :  { %1781 = vmatmul.mubr.msk.f32.vlgmr.msra.gmra.mxu0 %vm157_vm1, %v740_v29 }
 0x471   :  { %1796 = vmatpush3.xpose.msk.msra.mxu0 %vm157_vm1, %v1035_v28  ;;  %1799 = vmatprep.mubr.msk.f32.mxu0 %vm157_vm1, %v1029_v30 }
 0x472   :  { %1797 = vmatprep.subr.msk.mxu0 %vm157_vm1, %v1033_v31 }
 0x475   :  { %1798 = vmatpush3.xpose.msk.msra.mxu0 %vm157_vm1, %v1033_v31 }
 0x478   :  { %1800 = vmatmul.mubr.msk.f32.vlgmr.msra.gmra.mxu0 %vm157_vm1, %v1031_v32 }
 0x528   :  { %v2145_v33 = vpop.f32.mrf.mxu0 }
 0x52a   :  { %v2147_v34 = vpop.f32.mrf.mxu0 }
 0x530   :  { %v1782_v35 = vpop.f32.mrf.mxu0 }
 0x531   :  { %v829_v36 = vmul.f32 0.35355338, %v1782_v35 }
 0x532   :  { %v819_v37 = vpop.f32.mrf.mxu0 }
 0x533   :  { %v828_v38 = vmul.f32 0.35355338, %v819_v37  ;;  %v831_v39 = vadd.f32 %v829_v36, %v2092_v20 }
 0x535   :  { %v835_v40 = vsel %vm253_vm2, %v831_v39, -inf  ;;  %v830_v41 = vadd.f32 %v828_v38, %v2094_v23 }
 0x536   :  { %836 = vmax.xlane.f32.xlu0 %v835_v40 }
 0x537   :  { %v832_v42 = vsel %vm253_vm2, %v830_v41, -inf }
 0x538   :  { %833 = vmax.xlane.f32.xlu1 %v832_v42  ;;  %v1801_v53 = vpop.f32.mrf.mxu0 }
 0x539   :  { %v1120_v56 = vmul.f32 0.35355338, %v1801_v53 }
 0x53a   :  { %v1110_v54 = vpop.f32.mrf.mxu0 }
 0x53b   :  { %v1119_v55 = vmul.f32 0.35355338, %v1110_v54  ;;  %v1122_v58 = vadd.f32 %v1120_v56, %v2092_v20 }
 0x53d   :  { %v1121_v57 = vadd.f32 %v1119_v55, %v2094_v23  ;;  %v1126_v60 = vsel %vm253_vm2, %v1122_v58, -inf }
 0x53f   :  { %v1123_v59 = vsel %vm253_vm2, %v1121_v57, -inf }
 0x5bf   :  { %v837_v43 = vpop.xlane.xlu0 %836 }
 0x5c0   :  { %v839_v44 = vsub.f32 %v831_v39, %v837_v43 }
 0x5c1   :  { %v834_v45 = vpop.xlane.xlu1 %833 }
 0x5c2   :  { %v842_v46 = vmul.f32 1.442695, %v839_v44  ;;  %v838_v47 = vsub.f32 %v830_v41, %v834_v45  ;;  %v1654_v45 = vld [vmem:[#allocation7 + $0x1] ss:$0 sm:$0xff] }
 0x5c4   :  { %1872 = vpow2.f32 %v842_v46  ;;  %v840_v48 = vmul.f32 1.442695, %v838_v47 }
 0x5c6   :  { %1874 = vpow2.f32 %v840_v48 }
 0x5d1   :  { %v1873_v49 = vpop.eup %1872 }
 0x5d2   :  { %v847_v50 = vsel %vm253_vm2, %v1873_v49, 0.0 }
 0x5d3   :  { %v1875_v51 = vpop.eup %1874  ;;  %848 = vadd.xlane.f32.xlu1 %v847_v50 }
 0x5d4   :  { %v844_v52 = vsel %vm253_vm2, %v1875_v51, 0.0 }
 0x5d5   :  { %845 = vadd.xlane.f32.xlu0 %v844_v52 }
 0x5e4   :  { %856 = vrot.lane.b32.xlu1 %v2058_v8, %s1999_s11 }
 0x5e8   :  { %854 = vrot.lane.b32.xlu1 %v2060_v10, %s1999_s11 }
 0x5eb   :  { %653 = vrot.lane.b32.xlu0 %v2048_v4, %s1994_s6 }
 0x60a   :  { %1124 = vmax.xlane.f32.xlu0 %v1123_v59 }
 0x60c   :  { %1127 = vmax.xlane.f32.xlu1 %v1126_v60 }
 0x61d   :  { %942 = vrot.lane.b32.xlu1 %v2036_v1, %s1994_s6 }
 0x621   :  { %1145 = vrot.lane.b32.xlu1 %v2060_v10, %s2000_s12 }
 0x625   :  { %1233 = vrot.lane.b32.xlu1 %v2034_v0, %s1994_s6 }
 0x65c   :  { %v849_v4 = vpop.xlane.xlu1 %848 }
 0x65d   :  { %1876 = vrcp.f32 %v849_v4 }
 0x65e   :  { %v846_v23 = vpop.xlane.xlu0 %845 }
 0x65f   :  { %1878 = vrcp.f32 %v846_v23  ;;  %v63_v23 = vld [vmem:[#allocation5 + $0x38] sm:$0xff] }
 0x660   :  { %v857_v20 = vpop.permute.xlu1 %856  ;;  %1814 = vmatprep.subr.mxu0 %v63_v23 }
 0x661   :  { %1815 = vmatpush3.msra.mxu0 %v63_v23 }
 0x662   :  { %v654_v61 = vpop.permute.xlu0 %653 }
 0x663   :  { %1771 = vmatprep.subr.mxu1 %v654_v61 }
 0x664   :  { %1772 = vmatpush3.msra.mxu1 %v654_v61  ;;  %v855_v1 = vpop.permute.xlu1 %854 }
 0x665   :  { %1774 = vmatmul.mubr.msk.f32.vlgmr.msra.gmra.mxu1 %vm157_vm1, %v2129_v21  ;;  %1783 = vmatprep.subr.mxu1 %v857_v20 }
 0x666   :  { %1784 = vmatpush3.msra.mxu1 %v857_v20 }
 0x667   :  { %1785 = vmatprep.subr.mxu1 %v855_v1 }
 0x668   :  { %1786 = vmatpush3.msra.mxu1 %v855_v1 }
 0x66a   :  { %v1877_v10 = vpop.eup %1876 }
 0x66b   :  { %v853_v0 = vmul.f32 %v1877_v10, %v1873_v49 }
 0x66c   :  { %v1879_v62 = vpop.eup %1878 }
 0x66d   :  { %v852_v63 = vmul.f32 %v1879_v62, %v1875_v51 }
 0x66f   :  { %1787 = vmatprep.mubr.msk.f32.mxu1 %vm253_vm2, %v852_v63 }
 0x670   :  { %1788 = vmatmul.mubr.msk.f32.vlgmr.msra.gmra.mxu1 %vm253_vm2, %v853_v0 }
 0x693   :  { %v1125_v3 = vpop.xlane.xlu0 %1124 }
 0x694   :  { %v1129_v6 = vsub.f32 %v1121_v57, %v1125_v3 }
 0x695   :  { %v1128_v7 = vpop.xlane.xlu1 %1127 }
 0x696   :  { %v1130_v9 = vsub.f32 %v1122_v58, %v1128_v7  ;;  %v1131_v13 = vmul.f32 1.442695, %v1129_v6  ;;  %v1655_v7 = vld [vmem:[#allocation7 + $0x4] ss:$0 sm:$0xff] }
 0x698   :  { %v1133_v14 = vmul.f32 1.442695, %v1130_v9  ;;  %v1656_v9 = vld [vmem:[#allocation7 + $0x5] ss:$0 sm:$0xff] }
 0x699   :  { %v943_v15 = vpop.permute.xlu1 %942 }
 0x69a   :  { %1880 = vpow2.f32 %v1133_v14  ;;  %1790 = vmatprep.subr.mxu1 %v943_v15 }
 0x69b   :  { %1791 = vmatpush3.msra.mxu1 %v943_v15  ;;  %1882 = vpow2.f32 %v1131_v13 }
 0x69d   :  { %v1146_v29 = vpop.permute.xlu1 %1145 }
 0x6a1   :  { %v1234_v35 = vpop.permute.xlu1 %1233 }
 0x6a7   :  { %v1881_v16 = vpop.eup %1880 }
 0x6a8   :  { %v1138_v17 = vsel %vm253_vm2, %v1881_v16, 0.0  ;;  %v1883_v18 = vpop.eup %1882 }
 0x6a9   :  { %1139 = vadd.xlane.f32.xlu0 %v1138_v17  ;;  %v1135_v19 = vsel %vm253_vm2, %v1883_v18, 0.0 }
 0x6ad   :  { %1136 = vadd.xlane.f32.xlu0 %v1135_v19 }
 0x6c3   :  { %1147 = vrot.lane.b32.xlu0 %v2058_v8, %s2000_s12 }
 0x725   :  { %v1775_v21 = vpop.f32.mrf.mxu1 }
 0x726   :  { %v734_v36 = vadd.f32 %v1775_v21, %v2145_v33  ;;  %v1657_v21 = vld [vmem:[#allocation7 + $0x2] ss:$0 sm:$0xff] }
 0x727   :  { %v728_v22 = vpop.f32.mrf.mxu1 }
 0x728   :  { %v729_v38 = vadd.f32 %v728_v22, %v2147_v34 }
 0x730   :  { %v1789_v24 = vpop.f32.mrf.mxu1 }
 0x732   :  { %v932_v25 = vpop.f32.mrf.mxu1  ;;  %v1140_v26 = vpop.xlane.xlu0 %1139 }
 0x733   :  { %1792 = vmatprep.mubr.msk.f32.mxu1 %vm157_vm1, %v932_v25  ;;  %1884 = vrcp.f32 %v1140_v26 }
 0x734   :  { %1793 = vmatmul.mubr.msk.f32.vlgmr.msra.gmra.mxu1 %vm157_vm1, %v1789_v24 }
 0x736   :  { %v1137_v27 = vpop.xlane.xlu0 %1136 }
 0x737   :  { %1886 = vrcp.f32 %v1137_v27 }
 0x73a   :  { %v1148_v28 = vpop.permute.xlu0 %1147 }
 0x73b   :  { %1802 = vmatprep.subr.mxu1 %v1148_v28 }
 0x73c   :  { %1803 = vmatpush3.msra.mxu1 %v1148_v28 }
 0x73d   :  { %1804 = vmatprep.subr.mxu1 %v1146_v29 }
 0x73e   :  { %1805 = vmatpush3.msra.mxu1 %v1146_v29  ;;  %v1660_v29 = vld [vmem:[#allocation7 + $0x3] ss:$0 sm:$0xff] }
 0x73f   :  { %1809 = vmatprep.subr.mxu1 %v1234_v35 }
 0x740   :  { %v1885_v30 = vpop.eup %1884 }
 0x741   :  { %v1144_v32 = vmul.f32 %v1885_v30, %v1881_v16 }
 0x744   :  { %v1887_v8 = vpop.eup %1886 }
 0x745   :  { %v1143_v31 = vmul.f32 %v1887_v8, %v1883_v18 }
 0x747   :  { %1806 = vmatprep.mubr.msk.f32.mxu1 %vm253_vm2, %v1143_v31 }
 0x748   :  { %1807 = vmatmul.mubr.msk.f32.vlgmr.msra.gmra.mxu1 %vm253_vm2, %v1144_v32 }
 0x749   :  { %1810 = vmatpush3.msra.mxu1 %v1234_v35 }
 0x7f4   :  { %v1794_v37 = vpop.f32.mrf.mxu1 }
 0x7f5   :  { %v1027_v39 = vadd.f32 %v1794_v37, %v734_v36 }
 0x7f6   :  { %v1017_v40 = vpop.f32.mrf.mxu1 }
 0x7f7   :  { %v1026_v41 = vadd.f32 %v1017_v40, %v729_v38 }
 0x808   :  { %v1808_v42 = vpop.f32.mrf.mxu1 }
 0x80a   :  { %v1223_v43 = vpop.f32.mrf.mxu1 }
 0x80b   :  { %1811 = vmatprep.mubr.msk.f32.mxu1 %vm157_vm1, %v1223_v43 }
 0x80c   :  { %1812 = vmatmul.mubr.msk.f32.vlgmr.msra.gmra.mxu1 %vm157_vm1, %v1808_v42 }
 0x8cc   :  { %v1813_v44 = vpop.f32.mrf.mxu1 }
 0x8cd   :  { %v1318_v46 = vadd.f32 %v1813_v44, %v1027_v39 }
 0x8ce   :  { %v1308_v47 = vpop.f32.mrf.mxu1 }
 0x8cf   :  { %v1325_v48 = vadd.f32 %v1654_v45, %v1318_v46  ;;  %v1317_v49 = vadd.f32 %v1308_v47, %v1026_v41 }
 0x8d1   :  { %v1324_v50 = vadd.f32 %v1654_v45, %v1317_v49  ;;  %v1327_v33 = vadd.f32 %v1325_v48, %v2052_v5 }
 0x8d3   :  { %v1333_v34 = vsel %vm69_vm0, %v1327_v33, 0.0  ;;  %v1326_v51 = vadd.f32 %v1324_v50, %v2039_v2  ;;  %v62_v2 = vld [vmem:[#allocation5 + $0x28] sm:$0xff] }
 0x8d4   :  { %1334 = vadd.xlane.f32.xlu1 %v1333_v34  ;;  %1816 = vmatprep.subr.mxu0 %v62_v2 }
 0x8d5   :  { %v1330_v52 = vsel %vm69_vm0, %v1326_v51, 0.0  ;;  %1817 = vmatpush3.msra.mxu0 %v62_v2 }
 0x8d6   :  { %1331 = vadd.xlane.f32.xlu0 %v1330_v52  ;;  %1818 = vmatprep.subr.mxu0 %v2072_v11 }
 0x8d7   :  { %1819 = vmatpush3.msra.mxu0 %v2072_v11 }
 0x8d8   :  { %1820 = vmatprep.subr.mxu0 %v2074_v12 }
 0x8d9   :  { %1821 = vmatpush3.msra.mxu0 %v2074_v12 }
 0x8e5   :  { %1470 = vrot.lane.b32.xlu1 %v63_v23, %s1990_s2 }
 0x8e9   :  { %1466 = vrot.lane.b32.xlu1 %v2072_v11, %s1990_s2 }
 0x8ed   :  { %1464 = vrot.lane.b32.xlu1 %v2074_v12, %s1990_s2 }
 0x95d   :  { %v1335_v53 = vpop.xlane.xlu1 %1334 }
 0x95e   :  { %v1338_v54 = vmul.f32 0.03125, %v1335_v53 }
 0x95f   :  { %v1332_v55 = vpop.xlane.xlu0 %1331 }
 0x960   :  { %v1337_v56 = vmul.f32 0.03125, %v1332_v55  ;;  %v1340_v57 = vsub.f32 %v1327_v33, %v1338_v54  ;;  %v1663_v54 = vld [vmem:[#allocation7 + $0x6] ss:$0 sm:$0xff] }
 0x961   :  { %v1471_v20 = vpop.permute.xlu1 %1470 }
 0x962   :  { %v1339_v58 = vsub.f32 %v1326_v51, %v1337_v56  ;;  %v1342_v4 = vmul.f32 %v1340_v57, %v1340_v57  ;;  %1825 = vmatprep.subr.mxu1 %v1471_v20  ;;  %v1664_v56 = vld [vmem:[#allocation7 + $0x7] ss:$0 sm:$0xff] }
 0x963   :  { %1826 = vmatpush3.msra.mxu1 %v1471_v20 }
 0x964   :  { %v1341_v59 = vmul.f32 %v1339_v58, %v1339_v58  ;;  %v1346_v5 = vsel %vm69_vm0, %v1342_v4, 0.0 }
 0x965   :  { %v1467_v3 = vpop.permute.xlu1 %1466 }
 0x966   :  { %v1343_v60 = vsel %vm69_vm0, %v1341_v59, 0.0 }
 0x967   :  { %1344 = vadd.xlane.f32.xlu0 %v1343_v60 }
 0x969   :  { %v1465_v19 = vpop.permute.xlu1 %1464 }
 0x96b   :  { %1347 = vadd.xlane.f32.xlu0 %v1346_v5 }
 0x981   :  { %1468 = vrot.lane.b32.xlu0 %v62_v2, %s1990_s2 }
 0x9f0   :  { %v1345_v61 = vpop.xlane.xlu0 %1344 }
 0x9f1   :  { %v1349_v1 = vmul.f32 0.03125, %v1345_v61 }
 0x9f3   :  { %v1351_v10 = vadd.f32 1e-05, %v1349_v1 }
 0x9f4   :  { %v1348_v62 = vpop.xlane.xlu0 %1347 }
 0x9f5   :  { %1888 = vrsqrt.f32 %v1351_v10  ;;  %v1350_v63 = vmul.f32 0.03125, %v1348_v62 }
 0x9f7   :  { %v1352_v0 = vadd.f32 1e-05, %v1350_v63 }
 0x9f8   :  { %v1469_v11 = vpop.permute.xlu0 %1468 }
 0x9f9   :  { %1890 = vrsqrt.f32 %v1352_v0  ;;  %1827 = vmatprep.subr.mxu1 %v1469_v11 }
 0x9fa   :  { %1828 = vmatpush3.msra.mxu1 %v1469_v11 }
 0x9fb   :  { %1829 = vmatprep.subr.mxu1 %v1467_v3 }
 0x9fc   :  { %1830 = vmatpush3.msra.mxu1 %v1467_v3 }
 0x9fd   :  { %1831 = vmatprep.subr.mxu1 %v1465_v19 }
 0x9fe   :  { %1832 = vmatpush3.msra.mxu1 %v1465_v19 }
 0xa02   :  { %v1889_v6 = vpop.eup %1888 }
 0xa03   :  { %v1355_v12 = vmul.f32 %v1889_v6, %v1339_v58 }
 0xa05   :  { %v1361_v13 = vmul.f32 %v1655_v7, %v1355_v12 }
 0xa06   :  { %v1891_v14 = vpop.eup %1890 }
 0xa07   :  { %v1356_v15 = vmul.f32 %v1891_v14, %v1340_v57  ;;  %v1367_v16 = vadd.f32 %v1656_v9, %v1361_v13 }
 0xa09   :  { %v1362_v17 = vmul.f32 %v1655_v7, %v1356_v15  ;;  %1822 = vmatprep.mubr.msk.f32.mxu0 %vm69_vm0, %v1367_v16 }
 0xa0b   :  { %v1368_v18 = vadd.f32 %v1656_v9, %v1362_v17 }
 0xa0d   :  { %1823 = vmatmul.mubr.msk.f32.vlgmr.msra.gmra.mxu0 %vm69_vm0, %v1368_v18 }
 0xacd   :  { %v1824_v22 = vpop.f32.mrf.mxu0 }
 0xace   :  { %v1452_v24 = vadd.f32 %v1824_v22, %v1657_v21 }
 0xacf   :  { %v1446_v25 = vpop.f32.mrf.mxu0 }
 0xad0   :  { %v1447_v26 = vadd.f32 %v1657_v21, %v1446_v25  ;;  %v1456_v28 = vmax.f32 %v1452_v24, 0.0 }
 0xad2   :  { %v1455_v27 = vmax.f32 %v1447_v26, 0.0 }
 0xad4   :  { %1833 = vmatprep.mubr.msk.f32.mxu1 %vm69_vm0, %v1455_v27 }
 0xad5   :  { %1834 = vmatmul.mubr.msk.f32.vlgmr.msra.gmra.mxu1 %vm69_vm0, %v1456_v28 }
 0xb95   :  { %v1835_v30 = vpop.f32.mrf.mxu1 }
 0xb96   :  { %v1554_v8 = vadd.f32 %v1835_v30, %v1660_v29 }
 0xb97   :  { %v1548_v31 = vpop.f32.mrf.mxu1 }
 0xb98   :  { %v1549_v32 = vadd.f32 %v1660_v29, %v1548_v31  ;;  %v1558_v35 = vadd.f32 %v1554_v8, %v1368_v18 }
 0xb9a   :  { %v1564_v36 = vsel %vm69_vm0, %v1558_v35, 0.0  ;;  %v1557_v37 = vadd.f32 %v1549_v32, %v1367_v16 }
 0xb9b   :  { %1565 = vadd.xlane.f32.xlu1 %v1564_v36 }
 0xb9c   :  { %v1561_v38 = vsel %vm69_vm0, %v1557_v37, 0.0 }
 0xb9d   :  { %1562 = vadd.xlane.f32.xlu0 %v1561_v38 }
 0xc24   :  { %v1566_v39 = vpop.xlane.xlu1 %1565 }
 0xc25   :  { %v1568_v40 = vmul.f32 0.03125, %v1566_v39 }
 0xc26   :  { %v1563_v41 = vpop.xlane.xlu0 %1562 }
 0xc27   :  { %v1567_v42 = vmul.f32 0.03125, %v1563_v41  ;;  %v1570_v43 = vsub.f32 %v1558_v35, %v1568_v40 }
 0xc29   :  { %v1569_v44 = vsub.f32 %v1557_v37, %v1567_v42  ;;  %v1572_v47 = vmul.f32 %v1570_v43, %v1570_v43 }
 0xc2b   :  { %v1571_v45 = vmul.f32 %v1569_v44, %v1569_v44  ;;  %v1576_v48 = vsel %vm69_vm0, %v1572_v47, 0.0 }
 0xc2d   :  { %v1573_v46 = vsel %vm69_vm0, %v1571_v45, 0.0 }
 0xc2e   :  { %1574 = vadd.xlane.f32.xlu0 %v1573_v46 }
 0xc32   :  { %1577 = vadd.xlane.f32.xlu0 %v1576_v48 }
 0xcb7   :  { %v1575_v49 = vpop.xlane.xlu0 %1574 }
 0xcb8   :  { %v1579_v50 = vmul.f32 0.03125, %v1575_v49 }
 0xcba   :  { %v1581_v33 = vadd.f32 1e-05, %v1579_v50 }
 0xcbb   :  { %v1578_v34 = vpop.xlane.xlu0 %1577 }
 0xcbc   :  { %1892 = vrsqrt.f32 %v1581_v33  ;;  %v1580_v51 = vmul.f32 0.03125, %v1578_v34 }
 0xcbe   :  { %v1582_v52 = vadd.f32 1e-05, %v1580_v51 }
 0xcc0   :  { %1894 = vrsqrt.f32 %v1582_v52 }
 0xcc9   :  { %v1893_v53 = vpop.eup %1892 }
 0xcca   :  { %v1585_v55 = vmul.f32 %v1893_v53, %v1569_v44 }
 0xccc   :  { %v1591_v57 = vmul.f32 %v1663_v54, %v1585_v55 }
 0xccd   :  { %v1895_v58 = vpop.eup %1894 }
 0xcce   :  { %v1586_v59 = vmul.f32 %v1895_v58, %v1570_v43  ;;  %v1597_v60 = vadd.f32 %v1664_v56, %v1591_v57 }
 0xcd0   :  { %v1592_v4 = vmul.f32 %v1663_v54, %v1586_v59  ;;  %1599 = vst.msk [vmem:[#allocation8] sm:$0xff] %vm69_vm0, %v1597_v60 }
 0xcd2   :  { %v1598_v5 = vadd.f32 %v1664_v56, %v1592_v4 }
 0xcd4   :  { %1600 = vst.msk [vmem:[#allocation8 + $0x8] sm:$0xff] %vm69_vm0, %v1598_v5 }
 0xcd5   :  { %1967 = shalt.err (!%p1964_p5)
}
 0xcd6   :  { %1612 = dma.vmem_to_hbm [thread:$0]  %s1607_s14, 256, %s2220_s3, [#allocation4], %s1986_s22, %s1986_s22, %s1987_s23  }
 0xcd7   :  { %1980 = dma.done.wait [#allocation4], 256  }
 0xcd8   :  { %1981 = vsyncadd [#allocation4], 4294967040 }
 0xcd9   :  { %1616 = vsyncpa [#allocation3], 1 }
 0xcda   :  { %1617 = vsyncpa [#allocation6], 1 }
 0xcdb   :  { %1618 = vsyncpa [#allocation4], 1 }

</bundles_post_ra>
